<compile_context>
chip_gen: v5e
topology: v5e:2x2
jax: 0.10.0
libtpu: 0.0.40
codegen_flags: <defaults>
</compile_context>

<pallas_src>
import functools

import jax
import jax.numpy as jnp
from jax.experimental import pallas as pl
from jax.experimental.pallas import tpu as pltpu

LANE = 128
SUBLANE = 8


def _round_up(n, m):
    return ((n + m - 1) // m) * m


def dqn_kernel(x_ref,
               w1_ref, b1_ref,
               w2_ref, b2_ref,
               w3_ref, b3_ref,
               w4_ref, b4_ref,
               o_ref):
    # One (TB, in_features) activation tile; weights/biases are grid-invariant
    # and stay resident in VMEM. All matmuls are bf16 MXU ops with f32
    # accumulation; bias add / ReLU run in f32 on the VPU.
    h = jnp.dot(x_ref[...], w1_ref[...],
                preferred_element_type=jnp.float32) + b1_ref[...]
    h = jnp.maximum(h, 0.0).astype(jnp.bfloat16)

    h = jnp.dot(h, w2_ref[...],
                preferred_element_type=jnp.float32) + b2_ref[...]
    h = jnp.maximum(h, 0.0).astype(jnp.bfloat16)

    h = jnp.dot(h, w3_ref[...],
                preferred_element_type=jnp.float32) + b3_ref[...]
    h = jnp.maximum(h, 0.0).astype(jnp.bfloat16)

    out = jnp.dot(h, w4_ref[...],
                  preferred_element_type=jnp.float32) + b4_ref[...]
    # Lane-dense (TB, 128) store; down-cast (no-op here, f32 out) right before
    # the single store stream per tile.
    o_ref[...] = out.astype(o_ref.dtype)


@functools.partial(jax.jit, static_argnames=("block_batch",))
def dqnetwork_forward(x, params, block_batch=1024):
    """x: (batch, in_features) f32. params: dict of (W_t, b); W_t is (in, out)."""
    batch, in_features = x.shape
    out_features = params["w4"].shape[1]
    out_padded = _round_up(out_features, LANE)

    # bf16 inputs + weights (native MXU path); biases stay f32.
    x_bf = x.astype(jnp.bfloat16)
    w1 = params["w1"].astype(jnp.bfloat16)
    w2 = params["w2"].astype(jnp.bfloat16)
    w3 = params["w3"].astype(jnp.bfloat16)
    # Pad the last layer to a lane-dense (multiple-of-128) output width with
    # zero columns; the extra MXU columns are free and get sliced off below.
    w4 = jnp.pad(params["w4"],
                 ((0, 0), (0, out_padded - out_features))).astype(jnp.bfloat16)
    b1, b2, b3 = params["b1"], params["b2"], params["b3"]
    b4 = jnp.pad(params["b4"], ((0, 0), (0, out_padded - out_features)))

    # Batch tiling: large tiles amortize the ~0.35 us per-grid-step overhead;
    # tiny batches collapse to a single 8-row-aligned tile.
    tb = min(block_batch, _round_up(batch, SUBLANE))
    batch_padded = _round_up(batch, tb)
    if batch_padded != batch:
        x_bf = jnp.pad(x_bf, ((0, batch_padded - batch), (0, 0)))
    grid = (batch_padded // tb,)

    def resident(arr):
        # Full-extent block, constant block index -> DMA'd once, kept in VMEM.
        return pl.BlockSpec(arr.shape, lambda i: (0, 0))

    out = pl.pallas_call(
        dqn_kernel,
        out_shape=jax.ShapeDtypeStruct((batch_padded, out_padded), jnp.float32),
        grid=grid,
        in_specs=[
            pl.BlockSpec((tb, in_features), lambda i: (i, 0)),
            resident(w1), resident(b1),
            resident(w2), resident(b2),
            resident(w3), resident(b3),
            resident(w4), resident(b4),
        ],
        out_specs=pl.BlockSpec((tb, out_padded), lambda i: (i, 0)),
        compiler_params=pltpu.CompilerParams(
            dimension_semantics=("parallel",)),
    )(x_bf, w1, b1, w2, b2, w3, b3, w4, b4)

    # Drop padded batch rows and padded output lanes.
    return out[:batch, :out_features]


def init_params(key, in_features, out_features):
    """Deterministic synthetic init (PyTorch-like uniform fan-in bounds)."""
    dims = [(in_features, 16), (16, 32), (32, 32), (32, out_features)]
    params = {}
    for i, (fan_in, fan_out) in enumerate(dims, start=1):
        key, kw, kb = jax.random.split(key, 3)
        bound = 1.0 / jnp.sqrt(jnp.float32(fan_in))
        # Stored transposed relative to PyTorch: (in, out) so kernel does x @ W.
        params[f"w{i}"] = jax.random.uniform(kw, (fan_in, fan_out), jnp.float32,
                                             minval=-bound, maxval=bound)
        # Bias kept 2D (1, out) so it broadcasts over the batch tile.
        params[f"b{i}"] = jax.random.uniform(kb, (1, fan_out), jnp.float32,
                                             minval=-bound, maxval=bound)
    return params


def reference_forward(x, params):
    # Same numerics as the kernel: bf16 inputs/weights, f32 accumulation,
    # f32 bias add + ReLU.
    h = x.astype(jnp.bfloat16)
    for i in (1, 2, 3):
        w = params[f"w{i}"].astype(jnp.bfloat16)
        h = jnp.dot(h, w, preferred_element_type=jnp.float32) + params[f"b{i}"]
        h = jnp.maximum(h, 0.0).astype(jnp.bfloat16)
    w4 = params["w4"].astype(jnp.bfloat16)
    return jnp.dot(h, w4, preferred_element_type=jnp.float32) + params["b4"]


if __name__ == "__main__":
    key = jax.random.PRNGKey(0)
    batch, in_features, out_features = 2, 4, 3

    key, kx = jax.random.split(key)
    x = jax.random.normal(kx, (batch, in_features), jnp.float32)
    params = init_params(key, in_features, out_features)

    out = jax.block_until_ready(dqnetwork_forward(x, params))
    ref = reference_forward(x, params)

    assert out.shape == (batch, out_features)
    assert jnp.allclose(out, ref, atol=1e-4, rtol=1e-3), float(
        jnp.max(jnp.abs(out - ref)))

    print("KERNEL_OK")
</pallas_src>

<mosaic_0001>
module attributes {stable_mosaic.version = 11 : i64} {
  func.func @dqn_kernel(%arg0: i32, %arg1: memref<8x4xbf16, #tpu.memory_space<vmem>>, %arg2: memref<4x16xbf16, #tpu.memory_space<vmem>>, %arg3: memref<1x16xf32, #tpu.memory_space<vmem>>, %arg4: memref<16x32xbf16, #tpu.memory_space<vmem>>, %arg5: memref<1x32xf32, #tpu.memory_space<vmem>>, %arg6: memref<32x32xbf16, #tpu.memory_space<vmem>>, %arg7: memref<1x32xf32, #tpu.memory_space<vmem>>, %arg8: memref<32x128xbf16, #tpu.memory_space<vmem>>, %arg9: memref<1x128xf32, #tpu.memory_space<vmem>>, %arg10: memref<8x128xf32, #tpu.memory_space<vmem>>) attributes {dimension_semantics = [#tpu.dimension_semantics<parallel>], iteration_bounds = array<i64: 1>, scalar_prefetch = 0 : i64, scratch_operands = 0 : i64, tpu.core_type = #tpu.core_type<tc>, window_params = [{transform_indices = @transform_0, window_bounds = array<i64: 8, 4>}, {pipeline_mode = #tpu.pipeline_mode<synchronous>, transform_indices = @transform_1, window_bounds = array<i64: 4, 16>}, {pipeline_mode = #tpu.pipeline_mode<synchronous>, transform_indices = @transform_2, window_bounds = array<i64: 1, 16>}, {pipeline_mode = #tpu.pipeline_mode<synchronous>, transform_indices = @transform_3, window_bounds = array<i64: 16, 32>}, {pipeline_mode = #tpu.pipeline_mode<synchronous>, transform_indices = @transform_4, window_bounds = array<i64: 1, 32>}, {pipeline_mode = #tpu.pipeline_mode<synchronous>, transform_indices = @transform_5, window_bounds = array<i64: 32, 32>}, {pipeline_mode = #tpu.pipeline_mode<synchronous>, transform_indices = @transform_6, window_bounds = array<i64: 1, 32>}, {pipeline_mode = #tpu.pipeline_mode<synchronous>, transform_indices = @transform_7, window_bounds = array<i64: 32, 128>}, {pipeline_mode = #tpu.pipeline_mode<synchronous>, transform_indices = @transform_8, window_bounds = array<i64: 1, 128>}, {transform_indices = @transform_9, window_bounds = array<i64: 8, 128>}]} {
    %c0 = arith.constant 0 : index
    %c0_0 = arith.constant 0 : index
    %0 = vector.load %arg1[%c0, %c0_0] : memref<8x4xbf16, #tpu.memory_space<vmem>>, vector<8x4xbf16>
    %c0_1 = arith.constant 0 : index
    %c0_2 = arith.constant 0 : index
    %1 = vector.load %arg2[%c0_1, %c0_2] : memref<4x16xbf16, #tpu.memory_space<vmem>>, vector<4x16xbf16>
    %cst = arith.constant dense<0.000000e+00> : vector<8x16xf32>
    %2 = tpu.matmul %0, %1, %cst {dimension_numbers = #tpu.dot_dimension_numbers<[1], [0], [0], [1], [0, 0, 1, 1], [], []>} : vector<8x4xbf16>, vector<4x16xbf16>, vector<8x16xf32> -> vector<8x16xf32>
    %c0_3 = arith.constant 0 : index
    %c0_4 = arith.constant 0 : index
    %3 = vector.load %arg3[%c0_3, %c0_4] : memref<1x16xf32, #tpu.memory_space<vmem>>, vector<1x16xf32>
    %4 = vector.broadcast %3 : vector<1x16xf32> to vector<8x16xf32>
    %5 = arith.addf %2, %4 : vector<8x16xf32>
    %cst_5 = arith.constant 0.000000e+00 : f32
    %6 = vector.broadcast %cst_5 : f32 to vector<8x16xf32>
    %7 = arith.maximumf %5, %6 : vector<8x16xf32>
    %8 = arith.truncf %7 : vector<8x16xf32> to vector<8x16xbf16>
    %c0_6 = arith.constant 0 : index
    %c0_7 = arith.constant 0 : index
    %9 = vector.load %arg4[%c0_6, %c0_7] : memref<16x32xbf16, #tpu.memory_space<vmem>>, vector<16x32xbf16>
    %cst_8 = arith.constant dense<0.000000e+00> : vector<8x32xf32>
    %10 = tpu.matmul %8, %9, %cst_8 {dimension_numbers = #tpu.dot_dimension_numbers<[1], [0], [0], [1], [0, 0, 1, 1], [], []>} : vector<8x16xbf16>, vector<16x32xbf16>, vector<8x32xf32> -> vector<8x32xf32>
    %c0_9 = arith.constant 0 : index
    %c0_10 = arith.constant 0 : index
    %11 = vector.load %arg5[%c0_9, %c0_10] : memref<1x32xf32, #tpu.memory_space<vmem>>, vector<1x32xf32>
    %12 = vector.broadcast %11 : vector<1x32xf32> to vector<8x32xf32>
    %13 = arith.addf %10, %12 : vector<8x32xf32>
    %cst_11 = arith.constant 0.000000e+00 : f32
    %14 = vector.broadcast %cst_11 : f32 to vector<8x32xf32>
    %15 = arith.maximumf %13, %14 : vector<8x32xf32>
    %16 = arith.truncf %15 : vector<8x32xf32> to vector<8x32xbf16>
    %c0_12 = arith.constant 0 : index
    %c0_13 = arith.constant 0 : index
    %17 = vector.load %arg6[%c0_12, %c0_13] : memref<32x32xbf16, #tpu.memory_space<vmem>>, vector<32x32xbf16>
    %cst_14 = arith.constant dense<0.000000e+00> : vector<8x32xf32>
    %18 = tpu.matmul %16, %17, %cst_14 {dimension_numbers = #tpu.dot_dimension_numbers<[1], [0], [0], [1], [0, 0, 1, 1], [], []>} : vector<8x32xbf16>, vector<32x32xbf16>, vector<8x32xf32> -> vector<8x32xf32>
    %c0_15 = arith.constant 0 : index
    %c0_16 = arith.constant 0 : index
    %19 = vector.load %arg7[%c0_15, %c0_16] : memref<1x32xf32, #tpu.memory_space<vmem>>, vector<1x32xf32>
    %20 = vector.broadcast %19 : vector<1x32xf32> to vector<8x32xf32>
    %21 = arith.addf %18, %20 : vector<8x32xf32>
    %cst_17 = arith.constant 0.000000e+00 : f32
    %22 = vector.broadcast %cst_17 : f32 to vector<8x32xf32>
    %23 = arith.maximumf %21, %22 : vector<8x32xf32>
    %24 = arith.truncf %23 : vector<8x32xf32> to vector<8x32xbf16>
    %c0_18 = arith.constant 0 : index
    %c0_19 = arith.constant 0 : index
    %25 = vector.load %arg8[%c0_18, %c0_19] : memref<32x128xbf16, #tpu.memory_space<vmem>>, vector<32x128xbf16>
    %cst_20 = arith.constant dense<0.000000e+00> : vector<8x128xf32>
    %26 = tpu.matmul %24, %25, %cst_20 {dimension_numbers = #tpu.dot_dimension_numbers<[1], [0], [0], [1], [0, 0, 1, 1], [], []>} : vector<8x32xbf16>, vector<32x128xbf16>, vector<8x128xf32> -> vector<8x128xf32>
    %c0_21 = arith.constant 0 : index
    %c0_22 = arith.constant 0 : index
    %27 = vector.load %arg9[%c0_21, %c0_22] : memref<1x128xf32, #tpu.memory_space<vmem>>, vector<1x128xf32>
    %28 = vector.broadcast %27 : vector<1x128xf32> to vector<8x128xf32>
    %29 = arith.addf %26, %28 : vector<8x128xf32>
    %c0_23 = arith.constant 0 : index
    %c0_24 = arith.constant 0 : index
    %30 = vector.load %arg10[%c0_23, %c0_24] : memref<8x128xf32, #tpu.memory_space<vmem>>, vector<8x128xf32>
    tpu.vector_store %arg10[%c0_23, %c0_24], %29 {strides = array<i32>} : memref<8x128xf32, #tpu.memory_space<vmem>>, vector<8x128xf32>,
    return
  }
  func.func @transform_0(%arg0: i32) -> (i32, i32) {
    %c0_i32 = arith.constant 0 : i32
    %c0_i32_0 = arith.constant 0 : i32
    return %arg0, %c0_i32 : i32, i32
  }
  func.func @transform_1(%arg0: i32) -> (i32, i32) {
    %c0_i32 = arith.constant 0 : i32
    %c0_i32_0 = arith.constant 0 : i32
    %c0_i32_1 = arith.constant 0 : i32
    return %c0_i32, %c0_i32_0 : i32, i32
  }
  func.func @transform_2(%arg0: i32) -> (i32, i32) {
    %c0_i32 = arith.constant 0 : i32
    %c0_i32_0 = arith.constant 0 : i32
    %c0_i32_1 = arith.constant 0 : i32
    return %c0_i32, %c0_i32_0 : i32, i32
  }
  func.func @transform_3(%arg0: i32) -> (i32, i32) {
    %c0_i32 = arith.constant 0 : i32
    %c0_i32_0 = arith.constant 0 : i32
    %c0_i32_1 = arith.constant 0 : i32
    return %c0_i32, %c0_i32_0 : i32, i32
  }
  func.func @transform_4(%arg0: i32) -> (i32, i32) {
    %c0_i32 = arith.constant 0 : i32
    %c0_i32_0 = arith.constant 0 : i32
    %c0_i32_1 = arith.constant 0 : i32
    return %c0_i32, %c0_i32_0 : i32, i32
  }
  func.func @transform_5(%arg0: i32) -> (i32, i32) {
    %c0_i32 = arith.constant 0 : i32
    %c0_i32_0 = arith.constant 0 : i32
    %c0_i32_1 = arith.constant 0 : i32
    return %c0_i32, %c0_i32_0 : i32, i32
  }
  func.func @transform_6(%arg0: i32) -> (i32, i32) {
    %c0_i32 = arith.constant 0 : i32
    %c0_i32_0 = arith.constant 0 : i32
    %c0_i32_1 = arith.constant 0 : i32
    return %c0_i32, %c0_i32_0 : i32, i32
  }
  func.func @transform_7(%arg0: i32) -> (i32, i32) {
    %c0_i32 = arith.constant 0 : i32
    %c0_i32_0 = arith.constant 0 : i32
    %c0_i32_1 = arith.constant 0 : i32
    return %c0_i32, %c0_i32_0 : i32, i32
  }
  func.func @transform_8(%arg0: i32) -> (i32, i32) {
    %c0_i32 = arith.constant 0 : i32
    %c0_i32_0 = arith.constant 0 : i32
    %c0_i32_1 = arith.constant 0 : i32
    return %c0_i32, %c0_i32_0 : i32, i32
  }
  func.func @transform_9(%arg0: i32) -> (i32, i32) {
    %c0_i32 = arith.constant 0 : i32
    %c0_i32_0 = arith.constant 0 : i32
    return %arg0, %c0_i32 : i32, i32
  }
}

</mosaic_0001>

<bundles_post_ra>
// kernel: dqnetwork_forward.1
= control target key start
LH: loop header
LB: loop body
LE: loop exit
PB: predicated region body
PF: predicated region fallthrough
CT: control target
= control target key end

     0   :  { %vm43_vm0 = vcmask 1041408   ;;  %vm39_vm1 = vcmask 31744   ;;  %vm74_vm2 = vcmask 130048   ;;  %vm113_vm3 = vcmask 261120   ;;  %s292_s1 = inlined_call_operand.vmem [shape: bf16[4,16], index: 1, kind: input, shape index: {}]   ;;  %s293_s0 = inlined_call_operand.vmem [shape: bf16[8,4], index: 0, kind: input, shape index: {}]   ;;  %s294_s2 = inlined_call_operand.vmem [shape: f32[1,16], index: 2, kind: input, shape index: {}]   ;;  %s295_s4 = inlined_call_operand.vmem [shape: f32[1,32], index: 4, kind: input, shape index: {}]   ;;  %s296_s3 = inlined_call_operand.vmem [shape: bf16[16,32], index: 3, kind: input, shape index: {}]   ;;  %s297_s6 = inlined_call_operand.vmem [shape: f32[1,32], index: 6, kind: input, shape index: {}]   ;;  %s298_s5 = inlined_call_operand.vmem [shape: bf16[32,32], index: 5, kind: input, shape index: {}]   ;;  %s299_s8 = inlined_call_operand.vmem [shape: f32[1,128], index: 8, kind: input, shape index: {}]   ;;  %s300_s7 = inlined_call_operand.vmem [shape: bf16[32,128], index: 7, kind: input, shape index: {}]   ;;  %s301_s9 = inlined_call_operand.vmem [shape: f32[8,128], index: 9, kind: output, shape index: {}]  }
   0x1   :  { %v34_v0 = vld [vmem:[%s292_s1] sm:$0x3]  ;;  %v199_v10 = vld [vmem:[%s298_s5 + $0x8] sm:$0xff] }
   0x2   :  { %v45_v1 = vsel %vm43_vm0, %v34_v0, 0  ;;  %v33_v2 = vld [vmem:[%s293_s0] sm:$0xf]  ;;  %123 = vmatpush.bf16.msra.mxu2 %v199_v10  ;;  %v201_v18 = vld [vmem:[%s300_s7 + $0x8] sm:$0xff] }
   0x3   :  { %54 = vmatpush.bf16.msra.mxu0 %v45_v1  ;;  %v197_v3 = vld [vmem:[%s296_s3] sm:$0xff]  ;;  %161 = vmatpush.bf16.msra.mxu3 %v201_v18 }
   0x4   :  { %85 = vmatpush.bf16.msra.mxu1 %v197_v3  ;;  %v202_v4 = vld [vmem:[%s294_s2] ss:$0 sm:$0xff] }
   0x5   :  { %v198_v11 = vld [vmem:[%s298_s5] sm:$0xff] }
   0x6   :  { %173 = vmatmul.msk.bf16.vlgmr.msra.gmra.mxu0 %vm39_vm1, %v33_v2  ;;  %124 = vmatpush.bf16.msra.mxu2 %v198_v11  ;;  %v203_v12 = vld [vmem:[%s295_s4] ss:$0 sm:$0xff] }
   0x7   :  { %v200_v19 = vld [vmem:[%s300_s7] sm:$0xff] }
   0x8   :  { %162 = vmatpush.bf16.msra.mxu3 %v200_v19  ;;  %v204_v20 = vld [vmem:[%s297_s6] ss:$0 sm:$0xff] }
   0x9   :  { %v205_v26 = vld [vmem:[%s299_s8] ss:$0 sm:$0xff] }
  0x83   :  { %v56_v5 = vpop.f32.mrf.mxu0 }
  0x84   :  { %v57_v6 = vadd.f32 %v202_v4, %v56_v5 }
  0x86   :  { %v60_v7 = vmax.f32 %v57_v6, 0.0 }
  0x88   :  { %v61_v8 = vpack.c.bf16 %v60_v7, %v60_v7 }
  0x8a   :  { %178 = vmatmul.msk.bf16.vlgmr.msra.gmra.mxu1 %vm74_vm2, %v61_v8 }
  0x8b   :  { %v58_v9 = vpop.f32.mrf.mxu0 }
 0x107   :  { %v87_v13 = vpop.f32.mrf.mxu1 }
 0x108   :  { %v88_v14 = vadd.f32 %v203_v12, %v87_v13 }
 0x10a   :  { %v91_v15 = vmax.f32 %v88_v14, 0.0 }
 0x10c   :  { %v92_v16 = vpack.c.bf16 %v91_v15, %v91_v15 }
 0x10e   :  { %187 = vmatmul.msk.bf16.vlgmr.msra.gmra.mxu2 %vm113_vm3, %v92_v16 }
 0x10f   :  { %v89_v17 = vpop.f32.mrf.mxu1 }
 0x191   :  { %v126_v21 = vpop.f32.mrf.mxu2 }
 0x192   :  { %v127_v22 = vadd.f32 %v204_v20, %v126_v21 }
 0x194   :  { %v130_v23 = vmax.f32 %v127_v22, 0.0 }
 0x196   :  { %v131_v24 = vpack.c.bf16 %v130_v23, %v130_v23 }
 0x198   :  { %196 = vmatmul.msk.bf16.vlgmr.msra.gmra.mxu3 %vm113_vm3, %v131_v24 }
 0x199   :  { %v128_v25 = vpop.f32.mrf.mxu2 }
 0x21b   :  { %v164_v27 = vpop.f32.mrf.mxu3 }
 0x21c   :  { %v165_v28 = vadd.f32 %v205_v26, %v164_v27 }
 0x21e   :  { %168 = vst [vmem:[%s301_s9] sm:$0xff] %v165_v28 }
 0x223   :  { %v166_v29 = vpop.f32.mrf.mxu3 }

</bundles_post_ra>
